<compile_context>
chip_gen: v7x
topology: tpu7x:2x2x1
jax: 0.10.0
libtpu: 0.0.40
codegen_flags: <defaults>
</compile_context>

<pallas_src>
import functools

import jax
import jax.numpy as jnp
from jax.experimental import pallas as pl
from jax.experimental.pallas import tpu as pltpu

PAD = 128  # lane width; H and D_out are zero-padded to this


def deep_sets_kernel(x_ref, params_ref, out_ref, *, sets_per_block, set_size, d_in):
    rows = sets_per_block * set_size  # set elements handled by this grid step

    # Packed parameter slab (all zero-padded to PAD lanes):
    #   rows [0, d_in)         -> w_phi  (d_in, PAD)
    #   rows [d_in, d_in+PAD)  -> w_rho  (PAD, PAD)
    #   row  d_in+PAD          -> b_phi  (1, PAD)
    #   row  d_in+PAD+1        -> b_rho  (1, PAD)
    w_phi = params_ref[0:d_in, :]
    w_rho = params_ref[d_in:d_in + PAD, :]
    b_phi = params_ref[d_in + PAD:d_in + PAD + 1, :]
    b_rho = params_ref[d_in + PAD + 1:d_in + PAD + 2, :]

    # phi: Linear + ReLU on all TB*S set elements at once.
    x = x_ref[...]                                                   # (rows, d_in)
    embed = jnp.dot(x, w_phi, preferred_element_type=jnp.float32)    # (rows, PAD)
    embed = jnp.maximum(embed + b_phi, 0.0)

    # Permutation-invariant aggregation (torch.sum(embed, dim=0) per set) for all
    # TB sets at once via a 0/1 segment-sum matrix on the MXU (avoids reshapes).
    row_id = jax.lax.broadcasted_iota(jnp.int32, (sets_per_block, rows), 0)
    col_id = jax.lax.broadcasted_iota(jnp.int32, (sets_per_block, rows), 1)
    seg = jnp.logical_and(col_id >= row_id * set_size,
                          col_id < (row_id + 1) * set_size).astype(jnp.float32)
    agg = jnp.dot(seg, embed, preferred_element_type=jnp.float32)    # (TB, PAD)

    # rho: one well-shaped Linear over the stacked aggregates; dense (TB, PAD) store.
    out_ref[...] = jnp.dot(agg, w_rho, preferred_element_type=jnp.float32) + b_rho


def deep_sets_invariant(x, w_phi, b_phi, w_rho, b_rho, *, sets_per_block=8):
    """Batched DeepSetsInvariant forward.

    x: (B, S, D_in) f32. Returns (B, D_out) f32 with
    out[b] = rho(sum_s relu(x[b, s] @ w_phi + b_phi)).
    """
    b, s, d_in = x.shape
    h = w_phi.shape[1]
    d_out = w_rho.shape[1]
    assert h <= PAD and d_out <= PAD
    assert b % sets_per_block == 0, "pad the batch to a multiple of sets_per_block"

    dt = jnp.float32
    # Zero-pad weights/biases to PAD lanes once and pack into a single slab so the
    # kernel sees exactly two inputs (x, params): 2 HBM->VMEM DMAs, fetched once.
    w_phi_p = jnp.zeros((d_in, PAD), dt).at[:, :h].set(w_phi.astype(dt))
    w_rho_p = jnp.zeros((PAD, PAD), dt).at[:h, :d_out].set(w_rho.astype(dt))
    b_phi_p = jnp.zeros((1, PAD), dt).at[:, :h].set(b_phi.reshape(1, h).astype(dt))
    b_rho_p = jnp.zeros((1, PAD), dt).at[:, :d_out].set(b_rho.reshape(1, d_out).astype(dt))
    params = jnp.concatenate([w_phi_p, w_rho_p, b_phi_p, b_rho_p], axis=0)

    x2d = x.reshape(b * s, d_in).astype(dt)  # free reshape; each set stays contiguous
    rows_per_block = sets_per_block * s
    n_rows_params = d_in + PAD + 2

    kernel = functools.partial(
        deep_sets_kernel, sets_per_block=sets_per_block, set_size=s, d_in=d_in)

    # TODO(synk): for very large S, add a second ("arbitrary") grid axis over the
    # set dimension with a (sets_per_block, PAD) f32 VMEM accumulator (zeroed at
    # step 0, rho applied on the last step) so only one x tile is resident.
    out_padded = pl.pallas_call(
        kernel,
        out_shape=jax.ShapeDtypeStruct((b, PAD), dt),
        grid=(b // sets_per_block,),
        in_specs=[
            pl.BlockSpec((rows_per_block, d_in), lambda i: (i, 0)),
            pl.BlockSpec((n_rows_params, PAD), lambda i: (0, 0)),
        ],
        out_specs=pl.BlockSpec((sets_per_block, PAD), lambda i: (i, 0)),
        compiler_params=pltpu.CompilerParams(
            dimension_semantics=("parallel",)),
    )(x2d, params)

    return out_padded[:, :d_out]


def reference(x, w_phi, b_phi, w_rho, b_rho):
    embed = jnp.maximum(jnp.einsum("bsd,dh->bsh", x, w_phi) + b_phi, 0.0)
    agg = jnp.sum(embed, axis=1)
    return agg @ w_rho + b_rho


if __name__ == "__main__":
    # Small shapes: B=16 sets of S=8 elements each, D_in=32, hidden H=32, D_out=16.
    B, S, D_in, H, D_out = 16, 8, 32, 32, 16

    key = jax.random.PRNGKey(0)
    kx, kwp, kbp, kwr, kbr = jax.random.split(key, 5)

    x = jax.random.normal(kx, (B, S, D_in), dtype=jnp.float32)

    # Deterministic parameter init (synthetic; no checkpoint load).
    w_phi = jax.random.normal(kwp, (D_in, H), dtype=jnp.float32) * (1.0 / jnp.sqrt(D_in))
    b_phi = jax.random.normal(kbp, (1, H), dtype=jnp.float32) * 0.01
    w_rho = jax.random.normal(kwr, (H, D_out), dtype=jnp.float32) * (1.0 / jnp.sqrt(H))
    b_rho = jax.random.normal(kbr, (1, D_out), dtype=jnp.float32) * 0.01

    out = deep_sets_invariant(x, w_phi, b_phi, w_rho, b_rho)
    out = jax.block_until_ready(out)

    ref = reference(x, w_phi, b_phi, w_rho, b_rho)
    assert out.shape == (B, D_out)
    assert jnp.allclose(out, ref, atol=2e-5, rtol=2e-5), "mismatch vs. pure-JAX reference"

    print("KERNEL_OK")
</pallas_src>

<mosaic_0001>
module attributes {stable_mosaic.version = 11 : i64} {
  func.func @deep_sets_kernel(%arg0: i32, %arg1: memref<64x32xf32, #tpu.memory_space<vmem>>, %arg2: memref<162x128xf32, #tpu.memory_space<vmem>>, %arg3: memref<8x128xf32, #tpu.memory_space<vmem>>) attributes {dimension_semantics = [#tpu.dimension_semantics<parallel>], iteration_bounds = array<i64: 2>, scalar_prefetch = 0 : i64, scratch_operands = 0 : i64, tpu.core_type = #tpu.core_type<tc>, window_params = [{transform_indices = @transform_0, window_bounds = array<i64: 64, 32>}, {pipeline_mode = #tpu.pipeline_mode<synchronous>, transform_indices = @transform_1, window_bounds = array<i64: 162, 128>}, {transform_indices = @transform_2, window_bounds = array<i64: 8, 128>}]} {
    %c0 = arith.constant 0 : index
    %c0_0 = arith.constant 0 : index
    %0 = vector.load %arg2[%c0, %c0_0] : memref<162x128xf32, #tpu.memory_space<vmem>>, vector<32x128xf32>
    %c32 = arith.constant 32 : index
    %c0_1 = arith.constant 0 : index
    %1 = vector.load %arg2[%c32, %c0_1] : memref<162x128xf32, #tpu.memory_space<vmem>>, vector<128x128xf32>
    %c160 = arith.constant 160 : index
    %c0_2 = arith.constant 0 : index
    %2 = vector.load %arg2[%c160, %c0_2] : memref<162x128xf32, #tpu.memory_space<vmem>>, vector<1x128xf32>
    %c161 = arith.constant 161 : index
    %c0_3 = arith.constant 0 : index
    %3 = vector.load %arg2[%c161, %c0_3] : memref<162x128xf32, #tpu.memory_space<vmem>>, vector<1x128xf32>
    %c0_4 = arith.constant 0 : index
    %c0_5 = arith.constant 0 : index
    %4 = vector.load %arg1[%c0_4, %c0_5] : memref<64x32xf32, #tpu.memory_space<vmem>>, vector<64x32xf32>
    %cst = arith.constant dense<0.000000e+00> : vector<64x128xf32>
    %5 = tpu.matmul %4, %0, %cst {dimension_numbers = #tpu.dot_dimension_numbers<[1], [0], [0], [1], [0, 0, 1, 1], [], []>} : vector<64x32xf32>, vector<32x128xf32>, vector<64x128xf32> -> vector<64x128xf32>
    %6 = vector.broadcast %2 : vector<1x128xf32> to vector<64x128xf32>
    %7 = arith.addf %5, %6 : vector<64x128xf32>
    %cst_6 = arith.constant 0.000000e+00 : f32
    %8 = vector.broadcast %cst_6 : f32 to vector<64x128xf32>
    %9 = arith.maximumf %7, %8 : vector<64x128xf32>
    %10 = tpu.iota {dimensions = array<i32: 0>} : vector<8x64xi32>
    %11 = tpu.iota {dimensions = array<i32: 1>} : vector<8x64xi32>
    %c8_i32 = arith.constant 8 : i32
    %12 = vector.broadcast %c8_i32 : i32 to vector<8x64xi32>
    %13 = arith.muli %10, %12 : vector<8x64xi32>
    %14 = arith.cmpi sge, %11, %13 : vector<8x64xi32>
    %c1_i32 = arith.constant 1 : i32
    %15 = vector.broadcast %c1_i32 : i32 to vector<8x64xi32>
    %16 = arith.addi %10, %15 : vector<8x64xi32>
    %c8_i32_7 = arith.constant 8 : i32
    %17 = vector.broadcast %c8_i32_7 : i32 to vector<8x64xi32>
    %18 = arith.muli %16, %17 : vector<8x64xi32>
    %19 = arith.cmpi slt, %11, %18 : vector<8x64xi32>
    %20 = arith.andi %14, %19 : vector<8x64xi1>
    %21 = arith.extui %20 : vector<8x64xi1> to vector<8x64xi32>
    %22 = arith.sitofp %21 : vector<8x64xi32> to vector<8x64xf32>
    %cst_8 = arith.constant dense<0.000000e+00> : vector<8x128xf32>
    %23 = tpu.matmul %22, %9, %cst_8 {dimension_numbers = #tpu.dot_dimension_numbers<[1], [0], [0], [1], [0, 0, 1, 1], [], []>} : vector<8x64xf32>, vector<64x128xf32>, vector<8x128xf32> -> vector<8x128xf32>
    %cst_9 = arith.constant dense<0.000000e+00> : vector<8x128xf32>
    %24 = tpu.matmul %23, %1, %cst_9 {dimension_numbers = #tpu.dot_dimension_numbers<[1], [0], [0], [1], [0, 0, 1, 1], [], []>} : vector<8x128xf32>, vector<128x128xf32>, vector<8x128xf32> -> vector<8x128xf32>
    %25 = vector.broadcast %3 : vector<1x128xf32> to vector<8x128xf32>
    %26 = arith.addf %24, %25 : vector<8x128xf32>
    %c0_10 = arith.constant 0 : index
    %c0_11 = arith.constant 0 : index
    %27 = vector.load %arg3[%c0_10, %c0_11] : memref<8x128xf32, #tpu.memory_space<vmem>>, vector<8x128xf32>
    tpu.vector_store %arg3[%c0_10, %c0_11], %26 {strides = array<i32>} : memref<8x128xf32, #tpu.memory_space<vmem>>, vector<8x128xf32>,
    return
  }
  func.func @transform_0(%arg0: i32) -> (i32, i32) {
    %c0_i32 = arith.constant 0 : i32
    %c0_i32_0 = arith.constant 0 : i32
    return %arg0, %c0_i32 : i32, i32
  }
  func.func @transform_1(%arg0: i32) -> (i32, i32) {
    %c0_i32 = arith.constant 0 : i32
    %c0_i32_0 = arith.constant 0 : i32
    %c0_i32_1 = arith.constant 0 : i32
    return %c0_i32, %c0_i32_0 : i32, i32
  }
  func.func @transform_2(%arg0: i32) -> (i32, i32) {
    %c0_i32 = arith.constant 0 : i32
    %c0_i32_0 = arith.constant 0 : i32
    return %arg0, %c0_i32 : i32, i32
  }
}

</mosaic_0001>

<bundles_post_ra>
// kernel: tpu_custom_call.1
= control target key start
LH: loop header
LB: loop body
LE: loop exit
PB: predicated region body
PF: predicated region fallthrough
CT: control target
= control target key end

     0   :  { %7 = vsyncpa [#allocation3], 0  ;;  %s1088_s0 = inlined_call_operand.vmem [shape: f32[128,32], index: 0, kind: input, shape index: {}]   ;;  %s1089_s1 = inlined_call_operand.hbm [shape: f32[162,128], index: 1, kind: input, shape index: {}]   ;;  %s1090_s2 = inlined_call_operand.hbm [shape: f32[16,128], index: 2, kind: output, shape index: {}]  }
   0x1   :  { %8 = vsyncpa [#allocation4], 0 }
   0x2   :  { %10 = vsyncpa [#allocation4 + $0x1], 0  ;;  %s931_s9 = smov 0   ;;  %s933_s10 = smov 0  }
   0x3   :  { %s935_s11 = smov 0   ;;  %s937_s12 = smov 0  }
   0x4 LB: > { %s952_s13 = sadd.s32 4294967295, %s907_s12   ;;  %s577_s14 = sadd.s32 4294967294, %s907_s12   ;;  %s907_s12 = sphi %s937_s12, %s1106_s12   ;;  %s903_s11 = sphi %s935_s11, %s1105_s11   ;;  %s899_s10 = sphi %s933_s10, %s1104_s10   ;;  %s895_s9 = sphi %s931_s9, %s1103_s9  }
   0x5   : > { %s956_s15 = sadd.s32 1, %s907_s12   ;;  %s70_s16 = sadd.s32 1, %s903_s11 }
   0x6   : > { %s67_s17 = ssub.s32 %s907_s12, %s956_s15  ;;  %p80_p0 = scmp.ne.s32.totalorder %s903_s11, %s899_s10 }
   0x7   : > { %p68_p1 = scmp.eq.s32.totalorder %s67_s17, 0  ;;  %p81_p2 = scmp.eq.s32.totalorder %s952_s13, 1 }
   0x8   : > { %p86_p3 = scmp.ne.s32.totalorder %s899_s10, %s895_s9  ;;  %p87_p4 = scmp.eq.s32.totalorder %s577_s14, 1 }
   0x9   : > { %s967_s18 = scalar_select %p68_p1, %s903_s11, %s70_s16  }
   0xa   : > { %p969_p5 = por %p81_p2, %p80_p0  ;;  %p973_p6 = por %p87_p4, %p86_p3 }
   0xb   : > { %p578_p7 = scmp.ge.s32.totalorder %s907_s12, 1  ;;  %p94_p8 = scmp.lt.s32.totalorder %s907_s12, 3 }
   0xc   : > { %s1094_s19 = scalar_select %p969_p5, 1, 0 }
   0xd   : > { %s1095_s20 = scalar_select %p973_p6, 1, 0 }
   0xe   : > { %p1091_p9 = scmp.eq.s32.totalorder %s952_s13, 0  ;;  %p980_p10 = pnand %p578_p7, %p94_p8 }
   0xf   : > { %s909_s22 = smov [#allocation2]   ;;  %s813_s27 = scalar_lea.hbm %s1089_s1, 2688 }
  0x10   : > { %s1096_s21 = scalar_select %p980_p10, 1, 0 }
  0x11   : > { %s106_s23 = sshll.u32 %s909_s22, 4  ;;  %p764_p11 = pneg %p980_p10  ;;  %s107_s23 = int_to_ptr.vmem [resolvable:$true] %s106_s23 }
  0x12   : > { %p814_p13 = scmp.ne.s32.totalorder %s1089_s1, %s813_s27  ;;  %p820_p3 = scmp.lt.u32.totalorder %s813_s27, %s1089_s1 }
  0x13   : > { %p988_p12 = pnand %p1091_p9, %p764_p11 }
  0x15   : > { %p815_p0 = pneg %p988_p12 }
  0x17   : > { %p816_p1 = pnand %p815_p0, %p814_p13 }
  0x19   : > { %p817_p2 = pneg %p816_p1 }
  0x1b   : > { %p822_p4 = pnand %p820_p3, %p817_p2 }
  0x1d   : > { %825 = shalt.err (!%p822_p4)
}
  0x1e   : > { %s826_s4 = scalar_lea.vmem %s107_s23, 2688  ;;  %p834_p9 = scmp.lt.s32.totalorder %s107_s23, %s107_s23 }
  0x1f   : > { %p827_p7 = scmp.ne.s32.totalorder %s107_s23, %s826_s4  ;;  %p835_p6 = scmp.lt.s32.totalorder %s826_s4, %s826_s4 }
  0x21   : > { %p829_p8 = pnand %p827_p7, %p815_p0  ;;  %p836_p5 = por %p835_p6, %p834_p9 }
  0x23   : > { %p830_p11 = pneg %p829_p8 }
  0x25   : > { %p837_p10 = pnand %p836_p5, %p830_p11 }
  0x27   : > { %840 = shalt.err (!%p837_p10)
}
  0x28   : > { %s910_s5 = smov 128   ;;  %s911_s6 = smov 8  }
  0x29   : > { %767 = dma.hbm_to_vmem [thread:$0]  (!%p988_p12), %s1089_s1, 2688, %s107_s23, [#allocation3], %s910_s5, %s910_s5, %s911_s6  }
  0x2a   : > { %p1098_p13 = scmp.ne.s32.totalorder %s1096_s21, 0 }
  0x2b   : > { %p1099_p1 = scmp.eq.s32.totalorder (!%p1098_p13), %s952_s13, 0 }
  0x2c   : > { %131 = sbr.rel (%p1098_p13) target bundleno = 737 (0x2e1), region = 28 }
  0x33   : > { %886 = dma.done.wait (%p1099_p1), [#allocation3], 2688   ;;  %p1100_p0 = pmov %p1099_p1 }
  0x34   : > { %s584_s14 = sshll.u32 %s952_s13, 3  ;;  %vm193_vm0 = vcmask 261120   ;;  %v159_v0 = vld [vmem:[#allocation2] sm:$0xff]  ;;  %v160_v1 = vld [vmem:[#allocation2 + $0x8] sm:$0xff]  ;;  %v161_v2 = vld [vmem:[#allocation2 + $0x10] sm:$0xff]  ;;  %v912_v14 = vmov 0.0|0.0   ;;  %v331_v41 = vlaneseq }
  0x35   : > { %888 = vsyncadd (%p1100_p0), [#allocation3], 4294964608  ;;  %p154_p5 = scmp.lt.s32.totalorder %s584_s14, 15  ;;  %v714_v3 = vpack.c.bf16 %v160_v1, %v159_v0  ;;  %v162_v4 = vld [vmem:[#allocation2 + $0x18] sm:$0xff]  ;;  %734 = vmatprep.subr.bf16.mxu0 %v912_v14  ;;  %vm913_vm1 = vmmov 0   ;;  %v914_v15 = vmov 0.0  }
  0x36   : > { %v718_v6 = vpack.c.bf16 %v162_v4, %v161_v2  ;;  %711 = vmatprep.mubr.msk.f32.mxu0 %vm913_vm1, %v914_v15  ;;  %v163_v16 = vld [vmem:[#allocation2 + $0x20] sm:$0xff]  ;;  %v164_v17 = vld [vmem:[#allocation2 + $0x28] sm:$0xff]  ;;  %v165_v18 = vld [vmem:[#allocation2 + $0x30] sm:$0xff]  ;;  %v332_v46 = vshrl.u32 %v331_v41, 7  ;;  %v334_v60 = vand.u32 127, %v331_v41  ;;  %vm343_vm5 = vcmask 523264  }
  0x37   : > { %s1108_s14 = smov (!%p154_p5, %s584_s14), 15  ;;  %715 = vmatprep.subr.bf16.mxu1 %v714_v3  ;;  %v735_v19 = vpack.c.bf16 %v164_v17, %v163_v16  ;;  %v166_v20 = vld [vmem:[#allocation2 + $0x38] sm:$0xff]  ;;  %v167_v22 = vld [vmem:[#allocation2 + $0x40] sm:$0xff]  ;;  %v168_v23 = vld [vmem:[#allocation2 + $0x48] sm:$0xff]  ;;  %s150_s21 = sand.u32 1, %s899_s10  }
  0x38   : > { %s585_s16 = sshll.u32 %s1108_s14, 3  ;;  %717 = vmatpush3.bf16.msra.mxu1 %v714_v3  ;;  %v738_v21 = vpack.c.bf16 %v166_v20, %v165_v18  ;;  %v741_v24 = vpack.c.bf16 %v168_v23, %v167_v22  ;;  %v169_v25 = vld [vmem:[#allocation2 + $0x50] sm:$0xff]  ;;  %v170_v26 = vld [vmem:[#allocation2 + $0x58] sm:$0xff]  ;;  %v171_v28 = vld [vmem:[#allocation2 + $0x60] sm:$0xff]  ;;  %v337_v54 = vadd.s32 1, %v332_v46  ;;  %v335_v63 = vmul.u32 8, %v332_v46 }
  0x39   : > { %s157_s24 = scalar_lea.vmem %s1088_s0, %s585_s16  ;;  %719 = vmatprep.subr.bf16.mxu1 %v718_v6  ;;  %736 = vmatpush3.bf16.msra.mxu0 %v735_v19  ;;  %v744_v27 = vpack.c.bf16 %v170_v26, %v169_v25  ;;  %v172_v29 = vld [vmem:[#allocation2 + $0x68] sm:$0xff]  ;;  %v173_v31 = vld [vmem:[#allocation2 + $0x70] sm:$0xff]  ;;  %v174_v32 = vld [vmem:[#allocation2 + $0x78] sm:$0xff]  ;;  %s583_s23 = sshll.u32 %s150_s21, 3 }
  0x3a   : > { %v181_v5 = vld [vmem:[%s157_s24] sm:$0xff]  ;;  %v182_v7 = vld [vmem:[%s157_s24 + $0x8] sm:$0xff]  ;;  %v183_v8 = vld [vmem:[%s157_s24 + $0x10] sm:$0xff]  ;;  %737 = vmatprep.subr.bf16.mxu0 %v912_v14  ;;  %v747_v30 = vpack.c.bf16 %v172_v29, %v171_v28  ;;  %v750_v33 = vpack.c.bf16 %v174_v32, %v173_v31  ;;  %v338_v0 = vmul.u32 8, %v337_v54  ;;  %vm336_vm2 = vcmp.ge.s32.totalorder %v334_v60, %v335_v63  ;;  %s599_s25 = sshll.u32 %s952_s13, 7  ;;  %s152_s26 = scalar_lea.vmem [#allocation5], %s583_s23 }
  0x3b   : > { %648 = vmatprep.mubr.msk.f32.mxu1 %vm193_vm0, %v181_v5  ;;  %v184_v9 = vld [vmem:[%s157_s24 + $0x18] sm:$0xff]  ;;  %v185_v10 = vld [vmem:[%s157_s24 + $0x20] sm:$0xff]  ;;  %v186_v11 = vld [vmem:[%s157_s24 + $0x28] sm:$0xff]  ;;  %s506_s27 = sshll.u32 %s152_s26, 4  ;;  %s1046_s30 = scalar_lea.hbm %s1090_s2, %s599_s25  ;;  %s1048_s27 = int_to_ptr.vmem [resolvable:$true] %s506_s27 }
  0x3c   : > { %721 = vmatpush3.bf16.msra.mxu1 %v718_v6  ;;  %v187_v12 = vld [vmem:[%s157_s24 + $0x30] sm:$0xff]  ;;  %v188_v13 = vld [vmem:[%s157_s24 + $0x38] sm:$0xff]  ;;  %v175_v34 = vld [vmem:[#allocation2 + $0x80] sm:$0xff]  ;;  %vm339_vm3 = vcmp.lt.s32.totalorder %v334_v60, %v338_v0  ;;  %s493_s3 = scalar_lea.sflag [#allocation4], %s150_s21  ;;  %s841_s4 = scalar_lea.vmem %s1048_s27, 128 }
  0x3d   : > { %722 = vmatprep.subr.bf16.mxu1 %v912_v14  ;;  %739 = vmatpush3.bf16.msra.mxu0 %v738_v21  ;;  %v176_v35 = vld [vmem:[#allocation2 + $0x88] sm:$0xff]  ;;  %v177_v37 = vld [vmem:[#allocation2 + $0x90] sm:$0xff]  ;;  %v178_v38 = vld [vmem:[#allocation2 + $0x98] sm:$0xff]  ;;  %p842_p6 = scmp.ne.s32.totalorder %s1048_s27, %s841_s4  ;;  %p1101_p9 = scmp.ne.s32.totalorder %s1094_s19, 0 }
  0x3e   : > { %740 = vmatprep.subr.bf16.mxu0 %v912_v14  ;;  %v753_v36 = vpack.c.bf16 %v176_v35, %v175_v34  ;;  %v756_v39 = vpack.c.bf16 %v178_v38, %v177_v37  ;;  %v586_v40 = vld [vmem:[#allocation2 + $0xa0] ss:$0 sm:$0xff]  ;;  %vm340_vm4 = vmand %vm336_vm2, %vm339_vm3  ;;  %v597_v16 = vld [vmem:[#allocation2 + $0xa1] ss:$0 sm:$0xff]  ;;  %s915_s13 = smov [#allocation5]  }
  0x3f   : > { %649 = vmatmul.mubr.msk.f32.vlgmr.msra.gmra.mrb[0].mxu1 %vm193_vm0, %v182_v7  ;;  %p843_p10 = pnand %p842_p6, %p1101_p9  ;;  %s845_s5 = sshll.u32 %s915_s13, 4  ;;  %s846_s5 = int_to_ptr.vmem [resolvable:$false] %s845_s5 }
  0x40   : > { %651 = vmatprep.mubr.msk.f32.mxu1 %vm193_vm0, %v183_v8  ;;  %s847_s6 = scalar_lea.vmem %s846_s5, 256  ;;  %p848_p2 = scmp.lt.s32.totalorder %s1048_s27, %s846_s5 }
  0x41   : > { %742 = vmatpush3.bf16.msra.mxu0 %v741_v24  ;;  %p844_p12 = pneg %p843_p10  ;;  %p849_p3 = scmp.lt.s32.totalorder %s847_s6, %s841_s4 }
  0x42   : > { %743 = vmatprep.subr.bf16.mxu0 %v912_v14 }
  0x43   : > { %652 = vmatmul.mubr.msk.f32.gmra.mrb[2].mxu1 %vm193_vm0, %v184_v9  ;;  %p850_p4 = por %p849_p3, %p848_p2 }
  0x44   : > { %654 = vmatprep.mubr.msk.f32.mxu1 %vm193_vm0, %v185_v10 }
  0x45   : > { %745 = vmatpush3.bf16.msra.mxu0 %v744_v27  ;;  %p851_p7 = pnand %p850_p4, %p844_p12 }
  0x46   : > { %746 = vmatprep.subr.bf16.mxu0 %v912_v14 }
  0x47   : > { %655 = vmatmul.mubr.msk.f32.gmra.mrb[4].mxu1 %vm193_vm0, %v186_v11  ;;  %v595_v11 = vsel %vm340_vm4, 1.0, %v914_v15 }
  0x48   : > { %657 = vmatprep.mubr.msk.f32.mxu1 %vm193_vm0, %v187_v12 }
  0x49   : > { %748 = vmatpush3.bf16.msra.mxu0 %v747_v30 }
  0x4a   : > { %749 = vmatprep.subr.bf16.mxu0 %v912_v14 }
  0x4b   : > { %658 = vmatmul.mubr.msk.f32.gmra.mrb[6].mxu1 %vm193_vm0, %v188_v13 }
  0x4c   : > { %676 = vmatprep.mubr.msk.f32.mxu1 %vm913_vm1, %v914_v15 }
  0x4d   : > { %751 = vmatpush3.bf16.msra.mxu0 %v750_v33 }
  0x4e   : > { %752 = vmatprep.subr.bf16.mxu0 %v912_v14 }
  0x51   : > { %754 = vmatpush3.bf16.msra.mxu0 %v753_v36 }
  0x52   : > { %755 = vmatprep.subr.bf16.mxu0 %v912_v14 }
  0x55   : > { %757 = vmatpush3.bf16.msra.mxu0 %v756_v39 }
 0x112   : > { %v650_v42 = vpop.f32.mrb[0].mxu1 }
 0x113   : > { %v290_v43 = vadd.f32 %v650_v42, %v586_v40  ;;  %v284_v44 = vpop.f32.mrb[1].mxu1 }
 0x114   : > { %v285_v45 = vadd.f32 %v586_v40, %v284_v44 }
 0x115   : > { %v324_v47 = vmax.f32 %v290_v43, 0.0 }
 0x116   : > { %v323_v48 = vmax.f32 %v285_v45, 0.0  ;;  %v653_v49 = vpop.f32.mrb[2].mxu1 }
 0x117   : > { %v300_v50 = vadd.f32 %v653_v49, %v586_v40  ;;  %v294_v51 = vpop.f32.mrb[3].mxu1 }
 0x118   : > { %v723_v52 = vpack.c.bf16 %v324_v47, %v323_v48  ;;  %v295_v53 = vadd.f32 %v586_v40, %v294_v51 }
 0x119   : > { %v326_v55 = vmax.f32 %v300_v50, 0.0 }
 0x11a   : > { %v325_v56 = vmax.f32 %v295_v53, 0.0  ;;  %v656_v57 = vpop.f32.mrb[4].mxu1  ;;  %724 = vmatpush3.bf16.msra.mxu1 %v723_v52 }
 0x11b   : > { %v310_v58 = vadd.f32 %v656_v57, %v586_v40  ;;  %v304_v59 = vpop.f32.mrb[5].mxu1  ;;  %725 = vmatprep.subr.bf16.mxu1 %v912_v14 }
 0x11c   : > { %v726_v61 = vpack.c.bf16 %v326_v55, %v325_v56  ;;  %v305_v62 = vadd.f32 %v586_v40, %v304_v59 }
 0x11d   : > { %v328_v1 = vmax.f32 %v310_v58, 0.0 }
 0x11e   : > { %v327_v2 = vmax.f32 %v305_v62, 0.0  ;;  %v659_v3 = vpop.f32.mrb[6].mxu1  ;;  %727 = vmatpush3.bf16.msra.mxu1 %v726_v61 }
 0x11f   : > { %v320_v4 = vadd.f32 %v659_v3, %v586_v40  ;;  %v314_v5 = vpop.f32.mrb[7].mxu1  ;;  %728 = vmatprep.subr.bf16.mxu1 %v912_v14 }
 0x120   : > { %v729_v6 = vpack.c.bf16 %v328_v1, %v327_v2  ;;  %v315_v7 = vadd.f32 %v586_v40, %v314_v5 }
 0x121   : > { %v330_v8 = vmax.f32 %v320_v4, 0.0 }
 0x122   : > { %v329_v9 = vmax.f32 %v315_v7, 0.0  ;;  %730 = vmatpush3.bf16.msra.mxu1 %v729_v6 }
 0x123   : > { %731 = vmatprep.subr.bf16.mxu1 %v912_v14 }
 0x124   : > { %v732_v10 = vpack.c.bf16 %v330_v8, %v329_v9 }
 0x126   : > { %733 = vmatpush3.bf16.msra.mxu1 %v732_v10 }
 0x129   : > { %677 = vmatmul.mubr.msk.f32.vlgmr.msra.gmra.mrb[8].mxu1 %vm343_vm5, %v595_v11 }
 0x1fc   : > { %v413_v12 = vpop.f32.mrb[8].mxu1 }
 0x1fd   : > { %v678_v13 = vpop.f32.mrb[9].mxu1  ;;  %712 = vmatmul.mubr.f32.vlgmr.msra.gmra.mrb[0].mxu0 %v413_v12 }
 0x2d0   : > { %v487_v17 = vpop.f32.mrb[0].mxu0 }
 0x2d1   : > { %v488_v18 = vadd.f32 %v597_v16, %v487_v17  ;;  %v713_v14 = vpop.f32.mrb[1].mxu0 }
 0x2d3   : > { %491 = vst [vmem:[%s152_s26] sm:$0xff] %v488_v18 }
 0x2d4   : > { %854 = shalt.err (!%p851_p7)
}
 0x2d5   : > { %s855_s7 = scalar_lea.hbm %s1046_s30, 128  ;;  %s859_s16 = scalar_lea.hbm %s1090_s2, 256 }
 0x2d6   : > { %p856_p8 = scmp.ne.s32.totalorder %s1046_s30, %s855_s7  ;;  %p860_p1 = scmp.lt.u32.totalorder %s1046_s30, %s1090_s2 }
 0x2d7   : > { %p861_p0 = scmp.lt.u32.totalorder %s859_s16, %s855_s7  ;;  %p863_p6 = scmp.lt.u32.totalorder %s855_s7, %s1046_s30 }
 0x2d8   : > { %p857_p11 = pnand %p856_p8, %p1101_p9 }
 0x2d9   : > { %p862_p5 = por %p861_p0, %p860_p1 }
 0x2da   : > { %p858_p13 = pneg %p857_p11 }
 0x2db   : > { %p864_p10 = por %p863_p6, %p862_p5 }
 0x2dd   : > { %p865_p12 = pnand %p864_p10, %p858_p13 }
 0x2df   : > { %868 = shalt.err (!%p865_p12)
}
 0x2e0   : > { %762 = dma.vmem_to_hbm [thread:$0]  (%p1101_p9), %s1048_s27, 128, %s1046_s30, %s493_s3  }
 0x2e1 PF: > { %p774_p2 = scmp.ge.s32.totalorder %s907_s12, 2  ;;  %s518_s24 = sand.u32 1, %s895_s9  }
 0x2e2   : > { %p1102_p3 = scmp.ne.s32.totalorder %s1095_s20, 0  ;;  %s519_s21 = scalar_lea.sflag [#allocation4], %s518_s24 }
 0x2e4   : > { %p769_p4 = pnand %p774_p2, %p1102_p3 }
 0x2e6   : > { %890 = dma.done.wait (!%p769_p4), %s519_s21, 128  }
 0x2e7   : > { %892 = vsyncadd (!%p769_p4), %s519_s21, 4294967168  ;;  %p13_p7 = scmp.ge.s32.totalorder %s956_s15, 4   ;;  %s1103_s9 = smov %s899_s10 }
 0x2e8   : > { %s1104_s10 = smov %s903_s11  ;;  %s1105_s11 = smov %s967_s18 }
 0x2e9   : > { %s1106_s12 = smov %s956_s15  ;;  %15 = sbr.rel (!%p13_p7) target bundleno = 4 (0x4), region = 68 }
 0x2f0   :  { %524 = vsyncpa [#allocation3], 1 }
 0x2f1   :  { %526 = vsyncpa [#allocation3 + $0x1], 1 }
 0x2f2   :  { %527 = vsyncpa [#allocation4], 1 }
 0x2f3   :  { %529 = vsyncpa [#allocation4 + $0x1], 1 }

</bundles_post_ra>
